<compile_context>
chip_gen: v7x
topology: tpu7x:2x2x1
jax: 0.10.0
libtpu: 0.0.40
codegen_flags: <defaults>
</compile_context>

<pallas_src>
import jax
import jax.numpy as jnp
from jax.experimental import pallas as pl
from jax.experimental.pallas import tpu as pltpu


def _selective_ssm_kernel(x_ref, w1_ref, b1_ref, w2_ref, b2_ref, o_ref):
    # Two MXU matmuls (f32 accumulation) + f32 bias add + f32 SiLU, all in VMEM.
    x = x_ref[...]

    h = jnp.dot(x, w1_ref[...], preferred_element_type=jnp.float32)
    h = h + b1_ref[...].astype(jnp.float32)
    state = h * jax.nn.sigmoid(h)          # SiLU, kept in f32 (EUP path)

    out = jnp.dot(state.astype(w2_ref.dtype), w2_ref[...],
                  preferred_element_type=jnp.float32)
    out = out + b2_ref[...].astype(jnp.float32)
    o_ref[...] = out.astype(o_ref.dtype)


def selective_ssm(x, w1, b1, w2, b2, *, tm_packed=4096):
    """x: (B, S, D_in). w1: (D_in, D_state), b1: (D_state,),
    w2: (D_state, D_in), b2: (D_in,). Returns (B, S, D_in) in x.dtype."""
    B, S, D_in = x.shape
    D_state = w1.shape[1]
    M = B * S

    # ---- Lane-dense packing: fold `pack` consecutive rows into 128 lanes ----
    if D_in < 128 and 128 % D_in == 0:
        pack = 128 // D_in
    else:
        pack = 1  # already lane-dense (or not evenly packable)

    x2d = x.reshape(M, D_in)
    pad_rows = (-M) % pack
    if pad_rows:
        # TODO(synk): tail pad of < pack rows (not a full-array HBM copy).
        x2d = jnp.pad(x2d, ((0, pad_rows), (0, 0)))
    Mp = (M + pad_rows) // pack            # packed row count
    Din_p = pack * D_in                    # 128 when packing applies
    Dst_p = pack * D_state

    x_packed = x2d.reshape(Mp, Din_p)      # free: contiguous row-major reshape

    # Block-diagonal weights + tiled bias rows (built once in the wrapper).
    w1_big = jnp.kron(jnp.eye(pack, dtype=w1.dtype), w1)        # (Din_p, Dst_p)
    w2_big = jnp.kron(jnp.eye(pack, dtype=w2.dtype), w2)        # (Dst_p, Din_p)
    b1_big = jnp.tile(b1.astype(jnp.float32), pack).reshape(1, Dst_p)
    b2_big = jnp.tile(b2.astype(jnp.float32), pack).reshape(1, Din_p)

    # ---- Row tiling over packed rows ----
    # TM must be a multiple of 8 sublanes or equal the full row count; the
    # ragged last block is masked by Pallas (no wrapper pad/slice of the slab).
    if Mp <= tm_packed:
        TM = Mp
    else:
        TM = max(8, (tm_packed // 8) * 8)
    num_tiles = pl.cdiv(Mp, TM)

    itemsize = jnp.dtype(x.dtype).itemsize
    cost = pl.CostEstimate(
        flops=2 * 2 * Mp * Din_p * Dst_p,              # two (packed) matmuls
        transcendentals=Mp * Dst_p,                    # sigmoid in SiLU
        bytes_accessed=(2 * Mp * Din_p * itemsize      # x stream + out stream
                        + w1_big.size * jnp.dtype(w1.dtype).itemsize
                        + w2_big.size * jnp.dtype(w2.dtype).itemsize
                        + (Dst_p + Din_p) * 4),
    )

    out_packed = pl.pallas_call(
        _selective_ssm_kernel,
        out_shape=jax.ShapeDtypeStruct((Mp, Din_p), x.dtype),
        grid_spec=pl.GridSpec(
            grid=(num_tiles,),
            in_specs=[
                pl.BlockSpec((TM, Din_p), lambda i: (i, 0)),      # x: streamed
                pl.BlockSpec((Din_p, Dst_p), lambda i: (0, 0)),   # w1: resident
                pl.BlockSpec((1, Dst_p), lambda i: (0, 0)),       # b1: resident
                pl.BlockSpec((Dst_p, Din_p), lambda i: (0, 0)),   # w2: resident
                pl.BlockSpec((1, Din_p), lambda i: (0, 0)),       # b2: resident
            ],
            out_specs=pl.BlockSpec((TM, Din_p), lambda i: (i, 0)),
        ),
        compiler_params=pltpu.CompilerParams(
            dimension_semantics=("parallel",),       # row tiles across TCs (v7x)
            vmem_limit_bytes=32 * 1024 * 1024,       # pin; also lifts v5e default
        ),
        cost_estimate=cost,
    )(x_packed, w1_big, b1_big, w2_big, b2_big)

    out2d = out_packed.reshape(Mp * pack, D_in)
    if pad_rows:
        out2d = out2d[:M]
    return out2d.reshape(B, S, D_in)


def _reference(x, w1, b1, w2, b2):
    x = x.astype(jnp.float32)
    h = jnp.dot(x, w1.astype(jnp.float32),
                precision=jax.lax.Precision.HIGHEST) + b1.astype(jnp.float32)
    state = h * jax.nn.sigmoid(h)
    return jnp.dot(state, w2.astype(jnp.float32),
                   precision=jax.lax.Precision.HIGHEST) + b2.astype(jnp.float32)


if __name__ == "__main__":
    # Small shapes consistent with the module: batch=2, seq=8, input_dim=32,
    # state_dim=64.
    B, S, D_in, D_state = 2, 8, 32, 64

    key = jax.random.PRNGKey(0)
    kx, kw1, kb1, kw2, kb2, kx2, kx3 = jax.random.split(key, 7)

    x = jax.random.normal(kx, (B, S, D_in), dtype=jnp.float32)

    # Deterministic parameter init (uniform, like PyTorch Linear default scale).
    bound1 = 1.0 / jnp.sqrt(D_in)
    bound2 = 1.0 / jnp.sqrt(D_state)
    # Stored already transposed: (in_features, out_features).
    w1 = jax.random.uniform(kw1, (D_in, D_state), minval=-bound1, maxval=bound1)
    b1 = jax.random.uniform(kb1, (D_state,), minval=-bound1, maxval=bound1)
    w2 = jax.random.uniform(kw2, (D_state, D_in), minval=-bound2, maxval=bound2)
    b2 = jax.random.uniform(kb2, (D_in,), minval=-bound2, maxval=bound2)

    # --- f32 path, toy shape (single packed tile) ---
    out = jax.block_until_ready(selective_ssm(x, w1, b1, w2, b2))
    ref = _reference(x, w1, b1, w2, b2)
    assert out.shape == (B, S, D_in)
    assert jnp.allclose(out, ref, atol=2e-4, rtol=2e-4), "f32 mismatch vs reference"

    # --- f32 path, multi-tile with a ragged last block (no wrapper pad/slice)
    B2, S2 = 4, 600  # M = 2400 -> Mp = 600 packed rows; tm_packed=256 -> 3 tiles
    x_big = jax.random.normal(kx2, (B2, S2, D_in), dtype=jnp.float32)
    out_big = jax.block_until_ready(
        selective_ssm(x_big, w1, b1, w2, b2, tm_packed=256))
    ref_big = _reference(x_big, w1, b1, w2, b2)
    assert out_big.shape == (B2, S2, D_in)
    assert jnp.allclose(out_big, ref_big, atol=2e-4, rtol=2e-4), \
        "f32 multi-tile mismatch vs reference"

    # --- f32 path, row count not divisible by the pack factor (tail pad path)
    x_odd = jax.random.normal(kx3, (1, 6, D_in), dtype=jnp.float32)
    out_odd = jax.block_until_ready(selective_ssm(x_odd, w1, b1, w2, b2))
    ref_odd = _reference(x_odd, w1, b1, w2, b2)
    assert out_odd.shape == (1, 6, D_in)
    assert jnp.allclose(out_odd, ref_odd, atol=2e-4, rtol=2e-4), \
        "f32 ragged-row mismatch vs reference"

    # --- bf16 streaming path (halves HBM traffic; SiLU/bias stay f32) ---
    out_bf16 = jax.block_until_ready(
        selective_ssm(x_big.astype(jnp.bfloat16),
                      w1.astype(jnp.bfloat16), b1,
                      w2.astype(jnp.bfloat16), b2))
    assert out_bf16.dtype == jnp.bfloat16
    assert jnp.allclose(out_bf16.astype(jnp.float32), ref_big,
                        atol=5e-2, rtol=5e-2), "bf16 mismatch vs reference"

    print("KERNEL_OK")
</pallas_src>

<mosaic_0001>
module attributes {stable_mosaic.version = 11 : i64} {
  func.func @_selective_ssm_kernel(%arg0: i32, %arg1: memref<4x128xf32, #tpu.memory_space<vmem>>, %arg2: memref<128x256xf32, #tpu.memory_space<vmem>>, %arg3: memref<1x256xf32, #tpu.memory_space<vmem>>, %arg4: memref<256x128xf32, #tpu.memory_space<vmem>>, %arg5: memref<1x128xf32, #tpu.memory_space<vmem>>, %arg6: memref<4x128xf32, #tpu.memory_space<vmem>>) attributes {dimension_semantics = [#tpu.dimension_semantics<parallel>], iteration_bounds = array<i64: 1>, scalar_prefetch = 0 : i64, scratch_operands = 0 : i64, tpu.core_type = #tpu.core_type<tc>, window_params = [{transform_indices = @transform_0, window_bounds = array<i64: 4, 128>}, {pipeline_mode = #tpu.pipeline_mode<synchronous>, transform_indices = @transform_1, window_bounds = array<i64: 128, 256>}, {pipeline_mode = #tpu.pipeline_mode<synchronous>, transform_indices = @transform_2, window_bounds = array<i64: 1, 256>}, {pipeline_mode = #tpu.pipeline_mode<synchronous>, transform_indices = @transform_3, window_bounds = array<i64: 256, 128>}, {pipeline_mode = #tpu.pipeline_mode<synchronous>, transform_indices = @transform_4, window_bounds = array<i64: 1, 128>}, {transform_indices = @transform_5, window_bounds = array<i64: 4, 128>}]} {
    %c0 = arith.constant 0 : index
    %c0_0 = arith.constant 0 : index
    %0 = vector.load %arg1[%c0, %c0_0] : memref<4x128xf32, #tpu.memory_space<vmem>>, vector<4x128xf32>
    %c0_1 = arith.constant 0 : index
    %c0_2 = arith.constant 0 : index
    %1 = vector.load %arg2[%c0_1, %c0_2] : memref<128x256xf32, #tpu.memory_space<vmem>>, vector<128x256xf32>
    %cst = arith.constant dense<0.000000e+00> : vector<4x256xf32>
    %2 = tpu.matmul %0, %1, %cst {dimension_numbers = #tpu.dot_dimension_numbers<[1], [0], [0], [1], [0, 0, 1, 1], [], []>} : vector<4x128xf32>, vector<128x256xf32>, vector<4x256xf32> -> vector<4x256xf32>
    %c0_3 = arith.constant 0 : index
    %c0_4 = arith.constant 0 : index
    %3 = vector.load %arg3[%c0_3, %c0_4] : memref<1x256xf32, #tpu.memory_space<vmem>>, vector<1x256xf32>
    %4 = vector.broadcast %3 : vector<1x256xf32> to vector<4x256xf32>
    %5 = arith.addf %2, %4 : vector<4x256xf32>
    %6 = arith.negf %5 : vector<4x256xf32>
    %7 = math.exp %6 : vector<4x256xf32>
    %cst_5 = arith.constant 1.000000e+00 : f32
    %8 = vector.broadcast %cst_5 : f32 to vector<4x256xf32>
    %9 = arith.addf %8, %7 : vector<4x256xf32>
    %10 = arith.divf %8, %9 : vector<4x256xf32>
    %11 = arith.mulf %5, %10 : vector<4x256xf32>
    %c0_6 = arith.constant 0 : index
    %c0_7 = arith.constant 0 : index
    %12 = vector.load %arg4[%c0_6, %c0_7] : memref<256x128xf32, #tpu.memory_space<vmem>>, vector<256x128xf32>
    %cst_8 = arith.constant dense<0.000000e+00> : vector<4x128xf32>
    %13 = tpu.matmul %11, %12, %cst_8 {dimension_numbers = #tpu.dot_dimension_numbers<[1], [0], [0], [1], [0, 0, 1, 1], [], []>} : vector<4x256xf32>, vector<256x128xf32>, vector<4x128xf32> -> vector<4x128xf32>
    %c0_9 = arith.constant 0 : index
    %c0_10 = arith.constant 0 : index
    %14 = vector.load %arg5[%c0_9, %c0_10] : memref<1x128xf32, #tpu.memory_space<vmem>>, vector<1x128xf32>
    %15 = vector.broadcast %14 : vector<1x128xf32> to vector<4x128xf32>
    %16 = arith.addf %13, %15 : vector<4x128xf32>
    %c0_11 = arith.constant 0 : index
    %c0_12 = arith.constant 0 : index
    %17 = vector.load %arg6[%c0_11, %c0_12] : memref<4x128xf32, #tpu.memory_space<vmem>>, vector<4x128xf32>
    tpu.vector_store %arg6[%c0_11, %c0_12], %16 {strides = array<i32>} : memref<4x128xf32, #tpu.memory_space<vmem>>, vector<4x128xf32>,
    return
  }
  func.func @transform_0(%arg0: i32) -> (i32, i32) {
    %c0_i32 = arith.constant 0 : i32
    %c0_i32_0 = arith.constant 0 : i32
    return %arg0, %c0_i32 : i32, i32
  }
  func.func @transform_1(%arg0: i32) -> (i32, i32) {
    %c0_i32 = arith.constant 0 : i32
    %c0_i32_0 = arith.constant 0 : i32
    %c0_i32_1 = arith.constant 0 : i32
    return %c0_i32, %c0_i32_0 : i32, i32
  }
  func.func @transform_2(%arg0: i32) -> (i32, i32) {
    %c0_i32 = arith.constant 0 : i32
    %c0_i32_0 = arith.constant 0 : i32
    %c0_i32_1 = arith.constant 0 : i32
    return %c0_i32, %c0_i32_0 : i32, i32
  }
  func.func @transform_3(%arg0: i32) -> (i32, i32) {
    %c0_i32 = arith.constant 0 : i32
    %c0_i32_0 = arith.constant 0 : i32
    %c0_i32_1 = arith.constant 0 : i32
    return %c0_i32, %c0_i32_0 : i32, i32
  }
  func.func @transform_4(%arg0: i32) -> (i32, i32) {
    %c0_i32 = arith.constant 0 : i32
    %c0_i32_0 = arith.constant 0 : i32
    %c0_i32_1 = arith.constant 0 : i32
    return %c0_i32, %c0_i32_0 : i32, i32
  }
  func.func @transform_5(%arg0: i32) -> (i32, i32) {
    %c0_i32 = arith.constant 0 : i32
    %c0_i32_0 = arith.constant 0 : i32
    return %arg0, %c0_i32 : i32, i32
  }
}

</mosaic_0001>

<bundles_post_ra>
// kernel: tpu_custom_call.1
= control target key start
LH: loop header
LB: loop body
LE: loop exit
PB: predicated region body
PF: predicated region fallthrough
CT: control target
= control target key end

     0   :  { %10 = vsyncpa [#allocation3], 0  ;;  %s622_s0 = inlined_call_operand.hbm [shape: f32[4,128], index: 0, kind: input, shape index: {}]   ;;  %s623_s1 = inlined_call_operand.hbm [shape: f32[128,256], index: 1, kind: input, shape index: {}]   ;;  %s624_s2 = inlined_call_operand.vmem [shape: f32[1,256], index: 2, kind: input, shape index: {}]   ;;  %s625_s3 = inlined_call_operand.hbm [shape: f32[256,128], index: 3, kind: input, shape index: {}]   ;;  %s626_s4 = inlined_call_operand.vmem [shape: f32[1,128], index: 4, kind: input, shape index: {}]   ;;  %s627_s5 = inlined_call_operand.hbm [shape: f32[4,128], index: 5, kind: output, shape index: {}]  }
   0x1   :  { %11 = vsyncpa [#allocation6], 0 }
   0x2   :  { %12 = vsyncpa [#allocation4], 0  ;;  %s529_s18 = smov [#allocation5]   ;;  %s435_s22 = scalar_lea.hbm %s623_s1, 4096 }
   0x3   :  { %s28_s19 = sshll.u32 %s529_s18, 4  ;;  %p436_p0 = scmp.ne.s32.totalorder %s623_s1, %s435_s22  ;;  %s29_s19 = int_to_ptr.vmem [resolvable:$true] %s28_s19 }
   0x4   :  { %p439_p1 = scmp.lt.u32.totalorder %s435_s22, %s623_s1 }
   0x6   :  { %p441_p2 = pnand %p439_p1, %p436_p0 }
   0x8   :  { %444 = shalt.err (!%p441_p2)
}
   0x9   :  { %s445_s27 = scalar_lea.vmem %s29_s19, 4096  ;;  %p450_p4 = scmp.lt.s32.totalorder %s29_s19, %s29_s19 }
   0xa   :  { %p446_p3 = scmp.ne.s32.totalorder %s29_s19, %s445_s27  ;;  %p451_p5 = scmp.lt.s32.totalorder %s445_s27, %s445_s27 }
   0xc   :  { %p452_p6 = por %p451_p5, %p450_p4 }
   0xe   :  { %p453_p7 = pnand %p452_p6, %p446_p3 }
  0x10   :  { %456 = shalt.err (!%p453_p7)
}
  0x11   :  { %s530_s28 = smov 256   ;;  %s531_s29 = smov 16  }
  0x12   :  { %34 = dma.hbm_to_vmem [thread:$0]  %s623_s1, 4096, %s29_s19, [#allocation6], %s530_s28, %s530_s28, %s531_s29  }
  0x13   :  { %s532_s7 = smov [#allocation2]   ;;  %s533_s9 = smov [#allocation7]  }
  0x14   :  { %s19_s8 = sshll.u32 %s532_s7, 4  ;;  %s42_s10 = sshll.u32 %s533_s9, 4  ;;  %s20_s8 = int_to_ptr.vmem [resolvable:$true] %s19_s8  ;;  %s43_s10 = int_to_ptr.vmem [resolvable:$true] %s42_s10 }
  0x15   :  { %s457_s13 = scalar_lea.hbm %s622_s0, 64 }
  0x16   :  { %p458_p8 = scmp.ne.s32.totalorder %s622_s0, %s457_s13  ;;  %p461_p9 = scmp.lt.u32.totalorder %s457_s13, %s622_s0 }
  0x18   :  { %p463_p10 = pnand %p461_p9, %p458_p8 }
  0x1a   :  { %466 = shalt.err (!%p463_p10)
}
  0x1b   :  { %s467_s1 = scalar_lea.vmem %s20_s8, 64  ;;  %p472_p12 = scmp.lt.s32.totalorder %s20_s8, %s20_s8 }
  0x1c   :  { %p468_p11 = scmp.ne.s32.totalorder %s20_s8, %s467_s1  ;;  %p473_p13 = scmp.lt.s32.totalorder %s467_s1, %s467_s1 }
  0x1e   :  { %p474_p0 = por %p473_p13, %p472_p12 }
  0x20   :  { %p475_p1 = pnand %p474_p0, %p468_p11 }
  0x22   :  { %478 = shalt.err (!%p475_p1)
}
  0x23   :  { %22 = dma.hbm_to_vmem [thread:$0]  %s622_s0, 64, %s20_s8, [#allocation3]  }
  0x24   :  { %s479_s22 = scalar_lea.hbm %s625_s3, 4096 }
  0x25   :  { %p480_p2 = scmp.ne.s32.totalorder %s625_s3, %s479_s22  ;;  %p483_p3 = scmp.lt.u32.totalorder %s479_s22, %s625_s3 }
  0x27   :  { %p485_p4 = pnand %p483_p3, %p480_p2 }
  0x29   :  { %488 = shalt.err (!%p485_p4)
}
  0x2a   :  { %s489_s27 = scalar_lea.vmem %s43_s10, 4096  ;;  %p494_p6 = scmp.lt.s32.totalorder %s43_s10, %s43_s10 }
  0x2b   :  { %p490_p5 = scmp.ne.s32.totalorder %s43_s10, %s489_s27  ;;  %p495_p7 = scmp.lt.s32.totalorder %s489_s27, %s489_s27 }
  0x2d   :  { %p496_p8 = por %p495_p7, %p494_p6 }
  0x2f   :  { %p497_p9 = pnand %p496_p8, %p490_p5 }
  0x31   :  { %500 = shalt.err (!%p497_p9)
}
  0x32   :  { %s534_s0 = smov 128   ;;  %s535_s28 = smov 8  }
  0x33   :  { %48 = dma.hbm_to_vmem [thread:$0]  %s625_s3, 4096, %s43_s10, [#allocation6], %s534_s0, %s534_s0, %s535_s28  }
  0x34   :  { %523 = dma.done.wait [#allocation3], 64  }
  0x35   :  { %524 = vsyncadd [#allocation3], 4294967232 }
  0x36   :  { %525 = dma.done.wait [#allocation6], 8192  }
  0x37   :  { %526 = vsyncadd [#allocation6], 4294959104  ;;  %v536_v0 = vmov 0.0   ;;  %v62_v1 = vld [vmem:[#allocation5 + $0x8] sm:$0xff]  ;;  %v64_v2 = vld [vmem:[#allocation5 + $0x18] sm:$0xff]  ;;  %s537_s8 = smov [#allocation8]  }
  0x38   :  { %169 = vmatprep.mubr.f32.mxu0 %v536_v0  ;;  %v61_v3 = vld [vmem:[#allocation5] sm:$0xff]  ;;  %v354_v4 = vpack.c.bf16 %v64_v2, %v62_v1  ;;  %v63_v5 = vld [vmem:[#allocation5 + $0x10] sm:$0xff]  ;;  %v66_v6 = vld [vmem:[#allocation5 + $0x28] sm:$0xff]  ;;  %s306_s9 = sshll.u32 %s537_s8, 4  ;;  %s307_s9 = int_to_ptr.vmem [resolvable:$true] %s306_s9 }
  0x39   :  { %v68_v7 = vld [vmem:[#allocation5 + $0x38] sm:$0xff]  ;;  %v356_v8 = vpack.c.bf16 %v63_v5, %v61_v3  ;;  %v65_v10 = vld [vmem:[#allocation5 + $0x20] sm:$0xff]  ;;  %v67_v11 = vld [vmem:[#allocation5 + $0x30] sm:$0xff]  ;;  %s501_s10 = scalar_lea.vmem %s307_s9, 64  ;;  %p506_p11 = scmp.lt.s32.totalorder %s307_s9, %s307_s9 }
  0x3a   :  { %v358_v9 = vpack.c.bf16 %v68_v7, %v66_v6  ;;  %v70_v12 = vld [vmem:[#allocation5 + $0x48] sm:$0xff]  ;;  %355 = vmatprep.subr.bf16.mxu0 %v354_v4  ;;  %v72_v13 = vld [vmem:[#allocation5 + $0x58] sm:$0xff]  ;;  %v360_v14 = vpack.c.bf16 %v67_v11, %v65_v10  ;;  %v69_v16 = vld [vmem:[#allocation5 + $0x40] sm:$0xff]  ;;  %p502_p10 = scmp.ne.s32.totalorder %s307_s9, %s501_s10  ;;  %p507_p12 = scmp.lt.s32.totalorder %s501_s10, %s501_s10 }
  0x3b   :  { %357 = vmatpush1.bf16.msra.mxu0 %v356_v8  ;;  %v362_v15 = vpack.c.bf16 %v72_v13, %v70_v12  ;;  %v71_v17 = vld [vmem:[#allocation5 + $0x50] sm:$0xff]  ;;  %v74_v18 = vld [vmem:[#allocation5 + $0x68] sm:$0xff]  ;;  %v76_v19 = vld [vmem:[#allocation5 + $0x78] sm:$0xff] }
  0x3c   :  { %359 = vmatprep.subr.bf16.mxu0 %v358_v9  ;;  %v364_v20 = vpack.c.bf16 %v71_v17, %v69_v16  ;;  %v366_v21 = vpack.c.bf16 %v76_v19, %v74_v18  ;;  %v73_v22 = vld [vmem:[#allocation5 + $0x60] sm:$0xff]  ;;  %v75_v23 = vld [vmem:[#allocation5 + $0x70] sm:$0xff]  ;;  %v78_v24 = vld [vmem:[#allocation5 + $0x88] sm:$0xff]  ;;  %p508_p13 = por %p507_p12, %p506_p11 }
  0x3d   :  { %v80_v25 = vld [vmem:[#allocation5 + $0x98] sm:$0xff]  ;;  %v368_v26 = vpack.c.bf16 %v75_v23, %v73_v22  ;;  %v77_v28 = vld [vmem:[#allocation5 + $0x80] sm:$0xff]  ;;  %v79_v29 = vld [vmem:[#allocation5 + $0x90] sm:$0xff] }
  0x3e   :  { %v370_v27 = vpack.c.bf16 %v80_v25, %v78_v24  ;;  %v82_v30 = vld [vmem:[#allocation5 + $0xa8] sm:$0xff]  ;;  %v84_v31 = vld [vmem:[#allocation5 + $0xb8] sm:$0xff]  ;;  %v372_v32 = vpack.c.bf16 %v79_v29, %v77_v28  ;;  %v81_v34 = vld [vmem:[#allocation5 + $0xa0] sm:$0xff]  ;;  %p509_p0 = pnand %p508_p13, %p502_p10 }
  0x3f   :  { %361 = vmatpush1.bf16.msra.mxu0 %v360_v14  ;;  %v374_v33 = vpack.c.bf16 %v84_v31, %v82_v30  ;;  %v83_v35 = vld [vmem:[#allocation5 + $0xb0] sm:$0xff]  ;;  %v86_v36 = vld [vmem:[#allocation5 + $0xc8] sm:$0xff]  ;;  %v88_v37 = vld [vmem:[#allocation5 + $0xd8] sm:$0xff] }
  0x40   :  { %363 = vmatprep.subr.bf16.mxu0 %v362_v15  ;;  %v376_v38 = vpack.c.bf16 %v83_v35, %v81_v34  ;;  %v378_v39 = vpack.c.bf16 %v88_v37, %v86_v36  ;;  %v85_v40 = vld [vmem:[#allocation5 + $0xc0] sm:$0xff]  ;;  %v87_v41 = vld [vmem:[#allocation5 + $0xd0] sm:$0xff]  ;;  %v90_v42 = vld [vmem:[#allocation5 + $0xe8] sm:$0xff]  ;;  %v95_v34 = vlaneseq }
  0x41   :  { %v92_v43 = vld [vmem:[#allocation5 + $0xf8] sm:$0xff]  ;;  %v380_v44 = vpack.c.bf16 %v87_v41, %v85_v40  ;;  %v89_v46 = vld [vmem:[#allocation5 + $0xe0] sm:$0xff]  ;;  %v91_v47 = vld [vmem:[#allocation5 + $0xf0] sm:$0xff] }
  0x42   :  { %v382_v45 = vpack.c.bf16 %v92_v43, %v90_v42  ;;  %v384_v48 = vpack.c.bf16 %v91_v47, %v89_v46  ;;  %v60_v49 = vld [vmem:[#allocation2] sm:$0xf]  ;;  %v206_v50 = vld [vmem:[#allocation7 + $0x80] sm:$0xff]  ;;  %v207_v51 = vld [vmem:[#allocation7 + $0x88] sm:$0xff]  ;;  %v96_v35 = vshrl.u32 %v95_v34, 7 }
  0x43   :  { %365 = vmatpush1.bf16.msra.mxu0 %v364_v20  ;;  %v386_v52 = vpack.c.bf16 %v207_v51, %v206_v50  ;;  %v190_v53 = vld [vmem:[#allocation7] sm:$0xff]  ;;  %v191_v54 = vld [vmem:[#allocation7 + $0x8] sm:$0xff]  ;;  %v208_v56 = vld [vmem:[#allocation7 + $0x90] sm:$0xff] }
  0x44   :  { %367 = vmatprep.subr.bf16.mxu0 %v366_v21  ;;  %v388_v55 = vpack.c.bf16 %v191_v54, %v190_v53  ;;  %v209_v57 = vld [vmem:[#allocation7 + $0x98] sm:$0xff]  ;;  %v192_v59 = vld [vmem:[#allocation7 + $0x10] sm:$0xff]  ;;  %v210_v62 = vld [vmem:[#allocation7 + $0xa0] sm:$0xff]  ;;  %v97_v36 = vsub.s32 0, %v96_v35 }
  0x45   :  { %387 = vmatprep.subr.bf16.mxu1 %v386_v52  ;;  %v390_v58 = vpack.c.bf16 %v209_v57, %v208_v56  ;;  %v193_v60 = vld [vmem:[#allocation7 + $0x18] sm:$0xff]  ;;  %v211_v63 = vld [vmem:[#allocation7 + $0xa8] sm:$0xff]  ;;  %v194_v1 = vld [vmem:[#allocation7 + $0x20] sm:$0xff] }
  0x46   :  { %389 = vmatpush3.bf16.msra.mxu1 %v388_v55  ;;  %v392_v61 = vpack.c.bf16 %v193_v60, %v192_v59  ;;  %v394_v0 = vpack.c.bf16 %v211_v63, %v210_v62  ;;  %v195_v2 = vld [vmem:[#allocation7 + $0x28] sm:$0xff]  ;;  %v212_v4 = vld [vmem:[#allocation7 + $0xb0] sm:$0xff]  ;;  %v213_v5 = vld [vmem:[#allocation7 + $0xb8] sm:$0xff] }
  0x47   :  { %369 = vmatpush1.bf16.msra.mxu0 %v368_v26  ;;  %391 = vmatprep.subr.bf16.mxu1 %v390_v58  ;;  %v396_v3 = vpack.c.bf16 %v195_v2, %v194_v1  ;;  %v398_v6 = vpack.c.bf16 %v213_v5, %v212_v4  ;;  %v196_v7 = vld [vmem:[#allocation7 + $0x30] sm:$0xff]  ;;  %v197_v8 = vld [vmem:[#allocation7 + $0x38] sm:$0xff]  ;;  %v214_v10 = vld [vmem:[#allocation7 + $0xc0] sm:$0xff] }
  0x48   :  { %371 = vmatprep.subr.bf16.mxu0 %v370_v27  ;;  %v400_v9 = vpack.c.bf16 %v197_v8, %v196_v7  ;;  %v215_v11 = vld [vmem:[#allocation7 + $0xc8] sm:$0xff]  ;;  %v198_v13 = vld [vmem:[#allocation7 + $0x40] sm:$0xff]  ;;  %v216_v16 = vld [vmem:[#allocation7 + $0xd0] sm:$0xff] }
  0x49   :  { %v402_v12 = vpack.c.bf16 %v215_v11, %v214_v10  ;;  %v199_v14 = vld [vmem:[#allocation7 + $0x48] sm:$0xff]  ;;  %v217_v17 = vld [vmem:[#allocation7 + $0xd8] sm:$0xff]  ;;  %v200_v19 = vld [vmem:[#allocation7 + $0x50] sm:$0xff] }
  0x4a   :  { %393 = vmatpush3.bf16.msra.mxu1 %v392_v61  ;;  %v404_v15 = vpack.c.bf16 %v199_v14, %v198_v13  ;;  %v406_v18 = vpack.c.bf16 %v217_v17, %v216_v16  ;;  %v201_v20 = vld [vmem:[#allocation7 + $0x58] sm:$0xff]  ;;  %v218_v22 = vld [vmem:[#allocation7 + $0xe0] sm:$0xff]  ;;  %v219_v23 = vld [vmem:[#allocation7 + $0xe8] sm:$0xff] }
  0x4b   :  { %373 = vmatpush1.bf16.msra.mxu0 %v372_v32  ;;  %395 = vmatprep.subr.bf16.mxu1 %v394_v0  ;;  %v408_v21 = vpack.c.bf16 %v201_v20, %v200_v19  ;;  %v410_v24 = vpack.c.bf16 %v219_v23, %v218_v22  ;;  %v202_v25 = vld [vmem:[#allocation7 + $0x60] sm:$0xff]  ;;  %v203_v26 = vld [vmem:[#allocation7 + $0x68] sm:$0xff]  ;;  %v220_v28 = vld [vmem:[#allocation7 + $0xf0] sm:$0xff] }
  0x4c   :  { %375 = vmatprep.subr.bf16.mxu0 %v374_v33  ;;  %v412_v27 = vpack.c.bf16 %v203_v26, %v202_v25  ;;  %v221_v29 = vld [vmem:[#allocation7 + $0xf8] sm:$0xff]  ;;  %v204_v31 = vld [vmem:[#allocation7 + $0x70] sm:$0xff] }
  0x4d   :  { %v414_v30 = vpack.c.bf16 %v221_v29, %v220_v28  ;;  %v205_v32 = vld [vmem:[#allocation7 + $0x78] sm:$0xff] }
  0x4e   :  { %397 = vmatpush3.bf16.msra.mxu1 %v396_v3  ;;  %v416_v33 = vpack.c.bf16 %v205_v32, %v204_v31  ;;  %v93_v37 = vld [vmem:[%s624_s2] sm:$0x3] }
  0x4f   :  { %377 = vmatpush1.bf16.msra.mxu0 %v376_v38  ;;  %399 = vmatprep.subr.bf16.mxu1 %v398_v6  ;;  %v101_v38 = vsub.s32 1, %v96_v35  ;;  %v318_v56 = vld [vmem:[%s626_s4] ss:$0 sm:$0xff] }
  0x50   :  { %379 = vmatprep.subr.bf16.mxu0 %v378_v39  ;;  %v98_v39 = vrot.slane %v93_v37, %v97_v36 }
  0x51   :  { %v102_v40 = vrot.slane %v93_v37, %v101_v38 }
  0x52   :  { %401 = vmatpush3.bf16.msra.mxu1 %v400_v9 }
  0x53   :  { %381 = vmatpush1.bf16.msra.mxu0 %v380_v44  ;;  %403 = vmatprep.subr.bf16.mxu1 %v402_v12 }
  0x54   :  { %383 = vmatprep.subr.bf16.mxu0 %v382_v45 }
  0x56   :  { %405 = vmatpush3.bf16.msra.mxu1 %v404_v15 }
  0x57   :  { %385 = vmatpush1.bf16.msra.mxu0 %v384_v48  ;;  %407 = vmatprep.subr.bf16.mxu1 %v406_v18 }
  0x5a   :  { %170 = vmatmul.mubr.f32.vlgmr.msra.gmra.mrb[0].mxu0 %v60_v49  ;;  %409 = vmatpush3.bf16.msra.mxu1 %v408_v21 }
  0x5b   :  { %411 = vmatprep.subr.bf16.mxu1 %v410_v24 }
  0x5e   :  { %413 = vmatpush3.bf16.msra.mxu1 %v412_v27 }
  0x5f   :  { %415 = vmatprep.subr.bf16.mxu1 %v414_v30 }
  0x62   :  { %417 = vmatpush3.bf16.msra.mxu1 %v416_v33 }
 0x12d   :  { %v171_v41 = vpop.f32.mrb[0].mxu0 }
 0x12e   :  { %v172_v42 = vadd.f32 %v171_v41, %v98_v39  ;;  %v173_v43 = vpop.f32.mrb[1].mxu0 }
 0x12f   :  { %v174_v44 = vadd.f32 %v173_v43, %v102_v40 }
 0x130   :  { %v316_v45 = vmul.f32 -1.442695, %v172_v42 }
 0x131   :  { %v317_v46 = vmul.f32 -1.442695, %v174_v44 }
 0x132   :  { %427 = vpow2.f32 %v316_v45 }
 0x133   :  { %429 = vpow2.f32 %v317_v46 }
 0x13c   :  { %v428_v47 = vpop.eup %427 }
 0x13d   :  { %v430_v48 = vpop.eup %429  ;;  %v182_v49 = vadd.f32 1.0, %v428_v47 }
 0x13e   :  { %v183_v50 = vadd.f32 1.0, %v430_v48 }
 0x13f   :  { %431 = vrcp.f32 %v182_v49 }
 0x140   :  { %433 = vrcp.f32 %v183_v50 }
 0x149   :  { %v432_v51 = vpop.eup %431 }
 0x14a   :  { %v434_v52 = vpop.eup %433  ;;  %v188_v54 = vmul.f32 %v432_v51, %v172_v42 }
 0x14b   :  { %v189_v53 = vmul.f32 %v434_v52, %v174_v44 }
 0x14d   :  { %293 = vmatprep.mubr.f32.mxu1 %v189_v53 }
 0x14e   :  { %294 = vmatmul.mubr.f32.vlgmr.msra.gmra.mrb[0].mxu1 %v188_v54 }
 0x221   :  { %v351_v55 = vpop.f32.mrb[0].mxu1 }
 0x222   :  { %v352_v57 = vpop.f32.mrb[1].mxu1 }
 0x223   :  { %v353_v58 = vadd.f32 %v352_v57, %v351_v55 }
 0x225   :  { %v296_v59 = vadd.f32 %v353_v58, %v318_v56 }
 0x227   :  { %299 = vst [vmem:[#allocation8] sm:$0xf] %v296_v59 }
 0x228   :  { %512 = shalt.err (!%p509_p0)
}
 0x229   :  { %s513_s13 = scalar_lea.hbm %s627_s5, 64 }
 0x22a   :  { %p514_p1 = scmp.ne.s32.totalorder %s627_s5, %s513_s13  ;;  %p517_p2 = scmp.lt.u32.totalorder %s513_s13, %s627_s5 }
 0x22c   :  { %p519_p3 = pnand %p517_p2, %p514_p1 }
 0x22e   :  { %522 = shalt.err (!%p519_p3)
}
 0x22f   :  { %309 = dma.vmem_to_hbm [thread:$0]  %s307_s9, 64, %s627_s5, [#allocation4]  }
 0x230   :  { %527 = dma.done.wait [#allocation4], 64  }
 0x231   :  { %528 = vsyncadd [#allocation4], 4294967232 }
 0x232   :  { %313 = vsyncpa [#allocation3], 1 }
 0x233   :  { %314 = vsyncpa [#allocation6], 1 }
 0x234   :  { %315 = vsyncpa [#allocation4], 1 }

</bundles_post_ra>
